<compile_context>
chip_gen: v7x
topology: tpu7x:2x2x1
jax: 0.10.0
libtpu: 0.0.40
codegen_flags: <defaults>
</compile_context>

<pallas_src>
import functools

import jax
import jax.numpy as jnp
from jax import lax
from jax.experimental import pallas as pl
from jax.experimental.pallas import tpu as pltpu

LANES = 128
SUBLANES = 8
MAX_BLOCK_ROWS = 4096  # 4096 x 128 f32 = 2 MiB per input per buffer


def _bce_sum_kernel(p_ref, t_ref, o_ref, acc_ref, *, block_rows,
                    blocks_per_core, rows_valid, need_mask, acc_rows):
    """Accumulate sum(weight * bce_with_logits) over this core's blocks."""
    # Zero the lane-parallel accumulator at this core's first step.
    @pl.when(pl.program_id(1) == 0)
    def _():
        acc_ref[...] = jnp.zeros_like(acc_ref)

    x = p_ref[...].astype(jnp.float32)
    t = t_ref[...].astype(jnp.float32)

    # weights = targets * 0.8 + 0.1
    w = t * 0.8 + 0.1

    # Numerically stable BCE-with-logits:
    #   loss = max(x, 0) - x*t + log(1 + exp(-|x|))
    elem = jnp.maximum(x, 0.0) - x * t + jnp.log1p(jnp.exp(-jnp.abs(x)))
    ew = w * elem

    if need_mask:
        # Rows past the end of the (unpadded) input hold unspecified data;
        # select them to exactly 0 (select never propagates NaN/Inf from the
        # unselected branch).  Uses the *unclamped* block index so a fully
        # out-of-range (clamped) block contributes exactly 0.
        blk = pl.program_id(0) * blocks_per_core + pl.program_id(1)
        row0 = blk * block_rows
        rid = row0 + lax.broadcasted_iota(jnp.int32, (block_rows, LANES), 0)
        ew = jnp.where(rid < rows_valid, ew, 0.0)

    # Keep partial sums lane-parallel with acc_rows//8 independent vreg add
    # chains; the expensive cross-sublane/lane reduce happens in the epilogue.
    if acc_rows > 1:
        part = jnp.sum(ew.reshape(block_rows // acc_rows, acc_rows, LANES), axis=0)
    else:
        part = jnp.sum(ew, axis=0, keepdims=True)
    acc_ref[...] += part

    # This core's last step: fold sublanes, write a lane-dense (1, 128) row.
    @pl.when(pl.program_id(1) == pl.num_programs(1) - 1)
    def _():
        o_ref[...] = jnp.sum(acc_ref[...], axis=0, keepdims=True)


def _weighted_bce_sum_ref(p, t):
    # Pure-JAX sum of weight * bce_with_logits (used for tiny inputs / tails).
    x = p.astype(jnp.float32)
    tt = t.astype(jnp.float32)
    w = tt * 0.8 + 0.1
    elem = jnp.maximum(x, 0.0) - x * tt + jnp.log1p(jnp.exp(-jnp.abs(x)))
    return jnp.sum(w * elem)


def loss_wrapper(preds, targets):
    """Weighted BCEWithLogits loss (weight = t*0.8+0.1), mean reduction."""
    assert preds.shape == targets.shape
    n = int(preds.size)
    if n == 0:
        return jnp.float32(jnp.nan)  # mean over zero elements

    # Preserve narrow floating dtypes end-to-end; only promote bool/int labels.
    if not jnp.issubdtype(targets.dtype, jnp.floating):
        targets = targets.astype(jnp.float32)

    flat_p = preds.reshape(-1)
    flat_t = targets.reshape(-1)

    rows = n // LANES
    aligned = rows * LANES

    # Tiny-input fast path: not worth a pallas_call launch.
    if rows < SUBLANES:
        return _weighted_bce_sum_ref(flat_p, flat_t) / n

    if aligned == n:
        tail_sum = jnp.float32(0.0)
        p2 = flat_p.reshape(rows, LANES)   # free, bitcast-style reshape
        t2 = flat_t.reshape(rows, LANES)
    else:
        # Sub-128 remainder done in plain JAX; the prefix slice below is the
        # only path that may materialize a copy (rare for NCHW-style sizes).
        tail_sum = _weighted_bce_sum_ref(flat_p[aligned:], flat_t[aligned:])
        p2 = flat_p[:aligned].reshape(rows, LANES)
        t2 = flat_t[:aligned].reshape(rows, LANES)

    block_rows = rows if rows <= MAX_BLOCK_ROWS else MAX_BLOCK_ROWS
    num_blocks = pl.cdiv(rows, block_rows)
    num_cores = 2 if num_blocks >= 2 else 1          # v7x: 2 TCs; others: 1
    blocks_per_core = pl.cdiv(num_blocks, num_cores)
    need_mask = (num_cores * blocks_per_core * block_rows) != rows
    acc_rows = next((a for a in (32, 16, 8) if block_rows % a == 0), 1)

    if num_cores * blocks_per_core > num_blocks:
        # Odd block count split over 2 cores: clamp the redundant block's DMA
        # index into range; its contribution is masked to 0 in the kernel.
        in_map = lambda c, i: (jnp.minimum(c * blocks_per_core + i,
                                           num_blocks - 1), 0)
    else:
        in_map = lambda c, i: (c * blocks_per_core + i, 0)

    kernel = functools.partial(
        _bce_sum_kernel,
        block_rows=block_rows, blocks_per_core=blocks_per_core,
        rows_valid=rows, need_mask=need_mask, acc_rows=acc_rows)

    blk = pl.BlockSpec((block_rows, LANES), in_map)
    partials = pl.pallas_call(
        kernel,
        out_shape=jax.ShapeDtypeStruct((num_cores, LANES), jnp.float32),
        grid_spec=pltpu.PrefetchScalarGridSpec(
            num_scalar_prefetch=0,
            grid=(num_cores, blocks_per_core),
            in_specs=[blk, blk],
            out_specs=pl.BlockSpec((1, LANES), lambda c, i: (c, 0)),
            scratch_shapes=[pltpu.VMEM((acc_rows, LANES), jnp.float32)],
        ),
        compiler_params=pltpu.CompilerParams(
            dimension_semantics=("parallel", "arbitrary")),
    )(p2, t2)

    return (jnp.sum(partials) + tail_sum) / n


def _reference(preds, targets):
    # Pure-JAX reference of weighted BCEWithLogits, mean reduction.
    x = preds.astype(jnp.float32)
    t = targets.astype(jnp.float32)
    w = t * 0.8 + 0.1
    elem = jnp.maximum(x, 0.0) - x * t + jnp.log1p(jnp.exp(-jnp.abs(x)))
    return jnp.mean(w * elem)


if __name__ == "__main__":
    key = jax.random.PRNGKey(0)
    loss_fn = jax.jit(loss_wrapper)

    # Primary test: small NCHW input (batch=2, channels=4, spatial=16x16).
    k1, k2 = jax.random.split(key)
    preds = jax.random.normal(k1, (2, 4, 16, 16), dtype=jnp.float32)
    targets = (jax.random.uniform(k2, (2, 4, 16, 16)) > 0.5).astype(jnp.float32)
    out = jax.block_until_ready(loss_fn(preds, targets))
    ref = _reference(preds, targets)
    assert jnp.allclose(out, ref, rtol=1e-5, atol=1e-6), (out, ref)

    # Ragged size (not a multiple of 128): exercises the plain-JAX tail path.
    k3, k4 = jax.random.split(k1)
    preds_r = jax.random.normal(k3, (3, 5, 7, 11), dtype=jnp.float32)
    targets_r = (jax.random.uniform(k4, (3, 5, 7, 11)) > 0.5).astype(jnp.float32)
    out_r = jax.block_until_ready(loss_fn(preds_r, targets_r))
    ref_r = _reference(preds_r, targets_r)
    assert jnp.allclose(out_r, ref_r, rtol=1e-5, atol=1e-6), (out_r, ref_r)

    # Multi-block path: 2-core split + in-kernel masking of the partial block.
    k5, k6 = jax.random.split(k2)
    preds_b = jax.random.normal(k5, (4, 4, 200, 200), dtype=jnp.float32)
    targets_b = (jax.random.uniform(k6, (4, 4, 200, 200)) > 0.5).astype(jnp.float32)
    out_b = jax.block_until_ready(loss_fn(preds_b, targets_b))
    ref_b = _reference(preds_b, targets_b)
    assert jnp.allclose(out_b, ref_b, rtol=1e-4, atol=1e-6), (out_b, ref_b)

    print("KERNEL_OK")
</pallas_src>

<mosaic_0001>
module attributes {stable_mosaic.version = 11 : i64} {
  func.func @_bce_sum_kernel(%arg0: i32, %arg1: i32, %arg2: memref<16x128xf32, #tpu.memory_space<vmem>>, %arg3: memref<16x128xf32, #tpu.memory_space<vmem>>, %arg4: memref<1x128xf32, #tpu.memory_space<vmem>>, %arg5: memref<16x128xf32, #tpu.memory_space<vmem>>) attributes {dimension_semantics = [#tpu.dimension_semantics<parallel>, #tpu.dimension_semantics<arbitrary>], iteration_bounds = array<i64: 1, 1>, scalar_prefetch = 0 : i64, scratch_operands = 1 : i64, tpu.core_type = #tpu.core_type<tc>, window_params = [{transform_indices = @transform_0, window_bounds = array<i64: 16, 128>}, {transform_indices = @transform_1, window_bounds = array<i64: 16, 128>}, {transform_indices = @transform_2, window_bounds = array<i64: 1, 128>}]} {
    %c0_i32 = arith.constant 0 : i32
    %0 = arith.cmpi eq, %arg1, %c0_i32 : i32
    %1 = arith.extui %0 : i1 to i32
    %c0_i32_0 = arith.constant 0 : i32
    %2 = arith.cmpi ne, %1, %c0_i32_0 : i32
    scf.if %2 {
      %cst_14 = arith.constant 0.000000e+00 : f32
      %28 = vector.broadcast %cst_14 : f32 to vector<16x128xf32>
      %c0_15 = arith.constant 0 : index
      %c0_16 = arith.constant 0 : index
      %29 = vector.load %arg5[%c0_15, %c0_16] : memref<16x128xf32, #tpu.memory_space<vmem>>, vector<16x128xf32>
      tpu.vector_store %arg5[%c0_15, %c0_16], %28 {strides = array<i32>} : memref<16x128xf32, #tpu.memory_space<vmem>>, vector<16x128xf32>,
    } else {
    }
    %c0 = arith.constant 0 : index
    %c0_1 = arith.constant 0 : index
    %3 = vector.load %arg2[%c0, %c0_1] : memref<16x128xf32, #tpu.memory_space<vmem>>, vector<16x128xf32>
    %c0_2 = arith.constant 0 : index
    %c0_3 = arith.constant 0 : index
    %4 = vector.load %arg3[%c0_2, %c0_3] : memref<16x128xf32, #tpu.memory_space<vmem>>, vector<16x128xf32>
    %cst = arith.constant 8.000000e-01 : f32
    %5 = vector.broadcast %cst : f32 to vector<16x128xf32>
    %6 = arith.mulf %4, %5 : vector<16x128xf32>
    %cst_4 = arith.constant 1.000000e-01 : f32
    %7 = vector.broadcast %cst_4 : f32 to vector<16x128xf32>
    %8 = arith.addf %6, %7 : vector<16x128xf32>
    %cst_5 = arith.constant 0.000000e+00 : f32
    %9 = vector.broadcast %cst_5 : f32 to vector<16x128xf32>
    %10 = arith.maximumf %3, %9 : vector<16x128xf32>
    %11 = arith.mulf %3, %4 : vector<16x128xf32>
    %12 = arith.subf %10, %11 : vector<16x128xf32>
    %13 = math.absf %3 : vector<16x128xf32>
    %cst_6 = arith.constant 0.000000e+00 : f32
    %14 = vector.broadcast %cst_6 : f32 to vector<16x128xf32>
    %15 = arith.subf %14, %13 : vector<16x128xf32>
    %16 = math.exp %15 : vector<16x128xf32>
    %17 = math.log1p %16 : vector<16x128xf32>
    %18 = arith.addf %12, %17 : vector<16x128xf32>
    %19 = arith.mulf %8, %18 : vector<16x128xf32>
    %20 = vector.shape_cast %19 : vector<16x128xf32> to vector<1x16x128xf32>
    %cst_7 = arith.constant dense<0.000000e+00> : vector<16x128xf32>
    %21 = vector.multi_reduction <add>, %20, %cst_7 [0] : vector<1x16x128xf32> to vector<16x128xf32>
    %c0_8 = arith.constant 0 : index
    %c0_9 = arith.constant 0 : index
    %22 = vector.load %arg5[%c0_8, %c0_9] : memref<16x128xf32, #tpu.memory_space<vmem>>, vector<16x128xf32>
    %23 = arith.addf %22, %21 : vector<16x128xf32>
    %c0_10 = arith.constant 0 : index
    %c0_11 = arith.constant 0 : index
    %24 = vector.load %arg5[%c0_10, %c0_11] : memref<16x128xf32, #tpu.memory_space<vmem>>, vector<16x128xf32>
    tpu.vector_store %arg5[%c0_10, %c0_11], %23 {strides = array<i32>} : memref<16x128xf32, #tpu.memory_space<vmem>>, vector<16x128xf32>,
    %c0_i32_12 = arith.constant 0 : i32
    %25 = arith.cmpi eq, %arg1, %c0_i32_12 : i32
    %26 = arith.extui %25 : i1 to i32
    %c0_i32_13 = arith.constant 0 : i32
    %27 = arith.cmpi ne, %26, %c0_i32_13 : i32
    scf.if %27 {
      %c0_14 = arith.constant 0 : index
      %c0_15 = arith.constant 0 : index
      %28 = vector.load %arg5[%c0_14, %c0_15] : memref<16x128xf32, #tpu.memory_space<vmem>>, vector<16x128xf32>
      %cst_16 = arith.constant dense<0.000000e+00> : vector<128xf32>
      %29 = vector.multi_reduction <add>, %28, %cst_16 [0] : vector<16x128xf32> to vector<128xf32>
      %30 = vector.shape_cast %29 : vector<128xf32> to vector<1x128xf32>
      %c0_17 = arith.constant 0 : index
      %c0_18 = arith.constant 0 : index
      %31 = vector.load %arg4[%c0_17, %c0_18] : memref<1x128xf32, #tpu.memory_space<vmem>>, vector<1x128xf32>
      tpu.vector_store %arg4[%c0_17, %c0_18], %30 {strides = array<i32>} : memref<1x128xf32, #tpu.memory_space<vmem>>, vector<1x128xf32>,
    } else {
    }
    return
  }
  func.func @transform_0(%arg0: i32, %arg1: i32) -> (i32, i32) {
    %c1_i32 = arith.constant 1 : i32
    %0 = arith.muli %arg0, %c1_i32 : i32
    %1 = arith.addi %0, %arg1 : i32
    %c0_i32 = arith.constant 0 : i32
    %c0_i32_0 = arith.constant 0 : i32
    return %1, %c0_i32 : i32, i32
  }
  func.func @transform_1(%arg0: i32, %arg1: i32) -> (i32, i32) {
    %c1_i32 = arith.constant 1 : i32
    %0 = arith.muli %arg0, %c1_i32 : i32
    %1 = arith.addi %0, %arg1 : i32
    %c0_i32 = arith.constant 0 : i32
    %c0_i32_0 = arith.constant 0 : i32
    return %1, %c0_i32 : i32, i32
  }
  func.func @transform_2(%arg0: i32, %arg1: i32) -> (i32, i32) {
    %c0_i32 = arith.constant 0 : i32
    %c0_i32_0 = arith.constant 0 : i32
    return %arg0, %c0_i32 : i32, i32
  }
}

</mosaic_0001>

<bundles_post_ra>
// kernel: loss_wrapper.1
= control target key start
LH: loop header
LB: loop body
LE: loop exit
PB: predicated region body
PF: predicated region fallthrough
CT: control target
= control target key end

     0   :  { %s180_s0 = inlined_call_operand.vmem [shape: f32[16,128], index: 0, kind: input, shape index: {}]   ;;  %s181_s1 = inlined_call_operand.vmem [shape: f32[16,128], index: 1, kind: input, shape index: {}]   ;;  %s182_s2 = inlined_call_operand.vmem [shape: f32[1,128], index: 2, kind: output, shape index: {}]  }
   0x1   :  { %v61_v0 = vld [vmem:[%s180_s0] sm:$0xff]  ;;  %v62_v1 = vld [vmem:[%s180_s0 + $0x8] sm:$0xff] }
   0x2   :  { %v75_v2 = vand.u32 2147483647, %v61_v0  ;;  %v76_v3 = vand.u32 2147483647, %v62_v1  ;;  %v63_v14 = vld [vmem:[%s181_s1] sm:$0xff]  ;;  %v64_v15 = vld [vmem:[%s181_s1 + $0x8] sm:$0xff] }
   0x3   :  { %v69_v17 = vmax.f32 %v61_v0, 0.0  ;;  %v71_v18 = vmul.f32 %v63_v14, %v61_v0  ;;  %v70_v21 = vmax.f32 %v62_v1, 0.0  ;;  %v72_v22 = vmul.f32 %v64_v15, %v62_v1 }
   0x4   :  { %v77_v4 = vsub.f32 0.0, %v75_v2  ;;  %v78_v5 = vsub.f32 0.0, %v76_v3  ;;  %v65_v24 = vmul.f32 0.8, %v63_v14  ;;  %v66_v25 = vmul.f32 0.8, %v64_v15 }
   0x5   :  { %v73_v28 = vsub.f32 %v69_v17, %v71_v18  ;;  %v74_v31 = vsub.f32 %v70_v21, %v72_v22 }
   0x6   :  { %v79_v6 = vmul.f32 1.442695, %v77_v4  ;;  %v81_v7 = vmul.f32 1.442695, %v78_v5  ;;  %v67_v33 = vadd.f32 0.1, %v65_v24 }
   0x7   :  { %v68_v35 = vadd.f32 0.1, %v66_v25 }
   0x8   :  { %142 = vpow2.f32 %v79_v6 }
   0x9   :  { %144 = vpow2.f32 %v81_v7 }
  0x12   :  { %v143_v8 = vpop.eup %142 }
  0x13   :  { %v145_v9 = vpop.eup %144  ;;  %v83_v10 = vadd.f32 1.0, %v143_v8  ;;  %v86_v12 = vmul.f32 -0.5, %v143_v8  ;;  %v89_v19 = vand.u32 2147483647, %v143_v8 }
  0x14   :  { %v92_v11 = vadd.f32 1.0, %v145_v9  ;;  %v95_v13 = vmul.f32 -0.5, %v145_v9  ;;  %v98_v23 = vand.u32 2147483647, %v145_v9 }
  0x15   :  { %146 = vlog2.f32 %v83_v10  ;;  %v87_v16 = vadd.f32 1.0, %v86_v12  ;;  %vm90_vm0 = vcmp.lt.f32.partialorder %v89_v19, 0.0004427343 }
  0x16   :  { %148 = vlog2.f32 %v92_v11  ;;  %v96_v20 = vadd.f32 1.0, %v95_v13  ;;  %vm99_vm1 = vcmp.lt.f32.partialorder %v98_v23, 0.0004427343 }
  0x17   :  { %v88_v26 = vmul.f32 %v143_v8, %v87_v16 }
  0x18   :  { %v97_v29 = vmul.f32 %v145_v9, %v96_v20 }
  0x1f   :  { %v147_v27 = vpop.eup %146 }
  0x20   :  { %v149_v30 = vpop.eup %148  ;;  %v85_v32 = vmul.f32 0.6931472, %v147_v27 }
  0x21   :  { %v94_v34 = vmul.f32 0.6931472, %v149_v30 }
  0x22   :  { %v91_v36 = vsel %vm90_vm0, %v88_v26, %v85_v32 }
  0x23   :  { %v100_v37 = vsel %vm99_vm1, %v97_v29, %v94_v34  ;;  %v101_v38 = vadd.f32 %v91_v36, %v73_v28 }
  0x24   :  { %v102_v39 = vadd.f32 %v100_v37, %v74_v31 }
  0x25   :  { %v103_v40 = vmul.f32 %v101_v38, %v67_v33 }
  0x26   :  { %v104_v41 = vmul.f32 %v102_v39, %v68_v35 }
  0x28   :  { %v118_v42 = vadd.f32 %v104_v41, %v103_v40 }
  0x2a   :  { %v119_v43 = vrot.slane %v118_v42, 4 }
  0x2c   :  { %v120_v44 = vadd.f32 %v119_v43, %v118_v42 }
  0x2e   :  { %v121_v45 = vrot.slane %v120_v44, 2 }
  0x30   :  { %v122_v46 = vadd.f32 %v121_v45, %v120_v44 }
  0x32   :  { %v123_v47 = vrot.slane %v122_v46, 1 }
  0x34   :  { %v124_v48 = vadd.f32 %v123_v47, %v122_v46 }
  0x36   :  { %125 = vst [vmem:[%s182_s2] sm:$0x1] %v124_v48 }

</bundles_post_ra>
